<compile_context>
chip_gen: v6e
topology: v6e:2x2x1
jax: 0.10.0
libtpu: 0.0.40
codegen_flags: <defaults>
</compile_context>

<pallas_src>
from functools import partial

import numpy as np
import jax
import jax.numpy as jnp
from jax.experimental import pallas as pl
from jax.experimental.pallas import tpu as pltpu

GROUPS = 3
NTAPS = 9            # 3x3 taps
BN_EPS = 1e-5


# --------------------------------------------------------------------------- #
# Pallas kernel: [x-passthrough | conv1+bn2+relu+shuffle] -> 9-tap depthwise
# 3x3/s2 (+bn4) fused with 3x3/s2 avg-pool -> [identity | conv5+bn6] -> relu,
# single fused output tile per batch chunk.
# --------------------------------------------------------------------------- #
def _shufflenet_b_kernel(xph_ref, w1_ref, w3_ref, w5_ref, b5_ref, o_ref, y_ref,
                         *, bt, ho, wo, hph, wpad, cin, cb):
    # xph_ref : (bt, NPIX, Cin+1) zero-padded pixels, phase-major flat order, plus an
    #           interior-indicator channel (1 at real pixels, 0 on border / lane pad)
    # w1_ref  : (Cin+1, Cmid)  [[I_Cin | w1 (bn2+shuffle folded)], [0 | b1]]
    # w3_ref  : (NTAPS, Cmid)  per-tap weights: [1/9 (pool) | depthwise w3*bn4]
    # w5_ref  : (Cmid, Ctot)   [[I_Cin, 0], [0, w5 (bn6 folded)]]
    # b5_ref  : (1, Ctot)      [0 | b3 @ w5 + b5]
    # o_ref   : (bt, Ho*Wo, Ctot)  relu([pooled x | main branch])
    # y_ref   : VMEM scratch (bt*4*Hph, Wpad, Cmid) conv1 output on the phase planes
    c_mid = cin + cb
    npix = 4 * hph * wpad
    ctot = o_ref.shape[2]

    # ---- stage 1: ONE matmul over all padded pixels of the chunk; the indicator
    #      channel drives the bias row, so border pixels are exactly zero. ReLU only
    #      on the conv1 lanes (passthrough x lanes are left untouched for the pool).
    x = xph_ref[...].reshape(bt * npix, cin + 1)
    y = jnp.dot(x, w1_ref[...], preferred_element_type=jnp.float32)
    lane = jax.lax.broadcasted_iota(jnp.int32, (1, c_mid), 1)
    floor = jnp.where(lane < cin, jnp.finfo(jnp.float32).min, 0.0).astype(jnp.float32)
    y_ref[...] = jnp.maximum(y, floor).reshape(bt * 4 * hph, wpad, c_mid)

    # ---- stage 2: depthwise 3x3/s2 (+bn4) and 3x3/s2 avg-pool. Phase-major layout =>
    #      each tap is one static whole-image (Ho, Wo) window of one phase plane.
    w3 = w3_ref[...]
    taps = [w3[k:k + 1, :].reshape(1, 1, c_mid) for k in range(NTAPS)]   # hoisted
    accs = []
    for b in range(bt):
        acc = jnp.zeros((ho, wo, c_mid), jnp.float32)
        for kh in range(3):
            for kw in range(3):
                p = 2 * (kh % 2) + (kw % 2)
                row0 = (b * 4 + p) * hph + kh // 2
                win = y_ref[pl.ds(row0, ho), pl.ds(kw // 2, wo), :]      # (Ho, Wo, Cmid)
                acc = acc + win * taps[3 * kh + kw]
        accs.append(acc.reshape(ho * wo, c_mid))
    acc2 = accs[0] if bt == 1 else jnp.concatenate(accs, axis=0)         # (bt*Ho*Wo, Cmid)

    # ---- stage 3: ONE matmul producing the fused [pooled x | main] tile (identity
    #      block for pooled lanes, b3 folded into bias), relu, single full-tile store.
    out = jnp.dot(acc2, w5_ref[...], preferred_element_type=jnp.float32) + b5_ref[...]
    o_ref[...] = jnp.maximum(out, 0.0).reshape(bt, ho * wo, ctot)


# --------------------------------------------------------------------------- #
# Plain-JAX glue: BN/shuffle/bias folding and phase-major layout plumbing.
# --------------------------------------------------------------------------- #
def _fold_bn(gamma, beta, mean, var, eps=BN_EPS):
    s = gamma / jnp.sqrt(var + eps)
    return s, beta - s * mean


def _grouped_1x1_dense(w, groups):
    """(Cout, Cin//g, 1, 1) grouped 1x1 conv weight -> block-diagonal (Cin, Cout)."""
    cout, ipg = w.shape[0], w.shape[1]
    opg = cout // groups
    cin = ipg * groups
    dense = jnp.zeros((cin, cout), jnp.float32)
    for g in range(groups):
        blk = w[g * opg:(g + 1) * opg, :, 0, 0]          # (opg, ipg)
        dense = dense.at[g * ipg:(g + 1) * ipg, g * opg:(g + 1) * opg].set(blk.T)
    return dense


def shufflenet_unit_b_pallas(x_nchw, p, groups=GROUPS):
    B, Cin, H, W = x_nchw.shape
    assert H % 2 == 0 and W % 2 == 0
    Cb = p["w1"].shape[0]
    Cout = p["w5"].shape[0]
    Cmid = Cin + Cb                          # [x passthrough | conv1] lanes
    Ctot = Cin + Cout                        # [pooled x | main] output lanes
    Ho, Wo = H // 2, W // 2
    Hph, Wph = Ho + 1, Wo + 1                # phase-plane dims
    Wpad = ((Wph + 7) // 8) * 8              # tile-aligned plane width
    NPIX = 4 * Hph * Wpad

    # ---- stage-1 matrix: [I_Cin | w1(bn2+shuffle folded)], bias row driven by the
    #      interior-indicator channel (folds conv1 bias AND the border mask).
    s2, t2 = _fold_bn(p["g2"], p["beta2"], p["m2"], p["v2"])
    w1d = _grouped_1x1_dense(p["w1"], groups) * s2[None, :]
    b1f = s2 * p["b1"] + t2
    cpg = Cb // groups
    perm = np.array([(k % groups) * cpg + (k // groups) for k in range(Cb)])
    w1p, b1p = w1d[:, perm], b1f[perm]                   # channel shuffle folded
    w1aug = jnp.zeros((Cin + 1, Cmid), jnp.float32)
    w1aug = w1aug.at[:Cin, :Cin].set(jnp.eye(Cin, dtype=jnp.float32))
    w1aug = w1aug.at[:Cin, Cin:].set(w1p)
    w1aug = w1aug.at[Cin, Cin:].set(b1p)

    # ---- per-tap weights: 1/9 avg-pool weight for passthrough lanes, depthwise*bn4.
    s4, t4 = _fold_bn(p["g4"], p["beta4"], p["m4"], p["v4"])
    w3f = jnp.transpose(p["w3"][:, 0, :, :] * s4[:, None, None], (1, 2, 0)).reshape(NTAPS, Cb)
    b3f = s4 * p["b3"] + t4
    w3aug = jnp.concatenate([jnp.full((NTAPS, Cin), 1.0 / 9.0, jnp.float32), w3f], axis=1)

    # ---- stage-3 matrix: identity block for pooled lanes, conv5*bn6, b3 folded into b5.
    s6, t6 = _fold_bn(p["g6"], p["beta6"], p["m6"], p["v6"])
    w5f = _grouped_1x1_dense(p["w5"], groups) * s6[None, :]
    b5f = s6 * p["b5"] + t6
    w5full = jnp.zeros((Cmid, Ctot), jnp.float32)
    w5full = w5full.at[:Cin, :Cin].set(jnp.eye(Cin, dtype=jnp.float32))
    w5full = w5full.at[Cin:, Cin:].set(w5f)
    b5full = jnp.concatenate([jnp.zeros((Cin,), jnp.float32), b3f @ w5f + b5f]).reshape(1, Ctot)

    # ---- layout glue: NCHW -> zero-padded NHWC (+indicator) -> phase-major planes,
    #      plane width padded to a multiple of 8 so all in-kernel reshapes are aligned.
    x_nhwc = jnp.transpose(x_nchw, (0, 2, 3, 1)).astype(jnp.float32)
    xpad = jnp.pad(x_nhwc, ((0, 0), (1, 1), (1, 1), (0, 0)))
    ind = jnp.pad(jnp.ones((B, H, W, 1), jnp.float32), ((0, 0), (1, 1), (1, 1), (0, 0)))
    xa = jnp.concatenate([xpad, ind], axis=-1)                       # (B, H+2, W+2, Cin+1)
    planes = [xa[:, pr::2, pc::2, :] for pr in (0, 1) for pc in (0, 1)]
    xph = jnp.stack(planes, axis=1)                                  # (B, 4, Hph, Wph, Cin+1)
    xph = jnp.pad(xph, ((0, 0), (0, 0), (0, 0), (0, Wpad - Wph), (0, 0)))
    xph = xph.reshape(B, NPIX, Cin + 1)

    # Two parallel chunks keep both v7x TensorCores busy; within a chunk the batch is
    # folded into the block (one big matmul) to amortize step overhead on v5e/v6e.
    num_chunks = 2 if (B >= 2 and B % 2 == 0) else 1
    bt = B // num_chunks

    kernel = partial(_shufflenet_b_kernel, bt=bt, ho=Ho, wo=Wo, hph=Hph, wpad=Wpad,
                     cin=Cin, cb=Cb)

    flops = 2 * B * (NPIX * (Cin + 1) * Cmid + NTAPS * Ho * Wo * Cmid
                     + Ho * Wo * Cmid * Ctot)
    bytes_accessed = 4 * (B * (NPIX * (Cin + 1) + Ho * Wo * Ctot)
                          + (Cin + 1) * Cmid + NTAPS * Cmid + Cmid * Ctot + Ctot)

    out = pl.pallas_call(
        kernel,
        out_shape=jax.ShapeDtypeStruct((B, Ho * Wo, Ctot), jnp.float32),
        grid=(num_chunks,),
        in_specs=[
            pl.BlockSpec((bt, NPIX, Cin + 1), lambda c: (c, 0, 0)),
            pl.BlockSpec((Cin + 1, Cmid), lambda c: (0, 0)),
            pl.BlockSpec((NTAPS, Cmid), lambda c: (0, 0)),
            pl.BlockSpec((Cmid, Ctot), lambda c: (0, 0)),
            pl.BlockSpec((1, Ctot), lambda c: (0, 0)),
        ],
        out_specs=pl.BlockSpec((bt, Ho * Wo, Ctot), lambda c: (c, 0, 0)),
        scratch_shapes=[pltpu.VMEM((bt * 4 * Hph, Wpad, Cmid), jnp.float32)],
        compiler_params=pltpu.CompilerParams(dimension_semantics=("parallel",)),
        cost_estimate=pl.CostEstimate(flops=flops, transcendentals=0,
                                      bytes_accessed=bytes_accessed),
    )(xph, w1aug, w3aug, w5full, b5full)

    out = out.reshape(B, Ho, Wo, Ctot)                   # wrapper-side layout only
    return jnp.transpose(out, (0, 3, 1, 2))              # back to NCHW


# --------------------------------------------------------------------------- #
# Deterministic parameter init (same shapes as the PyTorch module __init__).
# --------------------------------------------------------------------------- #
def init_params(key, in_channels, out_channels, groups=GROUPS):
    outc = out_channels - in_channels
    assert outc % 4 == 0
    Cb = outc // 4
    assert in_channels % groups == 0 and Cb % groups == 0 and outc % groups == 0
    ks = jax.random.split(key, 20)

    def nrm(i, shape, scale=0.1):
        return scale * jax.random.normal(ks[i], shape, jnp.float32)

    return dict(
        w1=nrm(0, (Cb, in_channels // groups, 1, 1), 0.3), b1=nrm(1, (Cb,)),
        g2=1.0 + nrm(2, (Cb,)), beta2=nrm(3, (Cb,)), m2=nrm(4, (Cb,)),
        v2=1.0 + 0.1 * jnp.abs(jax.random.normal(ks[5], (Cb,), jnp.float32)),
        w3=nrm(6, (Cb, 1, 3, 3), 0.3), b3=nrm(7, (Cb,)),
        g4=1.0 + nrm(8, (Cb,)), beta4=nrm(9, (Cb,)), m4=nrm(10, (Cb,)),
        v4=1.0 + 0.1 * jnp.abs(jax.random.normal(ks[11], (Cb,), jnp.float32)),
        w5=nrm(12, (outc, Cb // groups, 1, 1), 0.3), b5=nrm(13, (outc,)),
        g6=1.0 + nrm(14, (outc,)), beta6=nrm(15, (outc,)), m6=nrm(16, (outc,)),
        v6=1.0 + 0.1 * jnp.abs(jax.random.normal(ks[17], (outc,), jnp.float32)),
    )


# --------------------------------------------------------------------------- #
# Independent pure-JAX reference (NCHW, lax convs) used only for verification.
# --------------------------------------------------------------------------- #
def _bn_ref(v, g, b, m, var, eps=BN_EPS):
    return (g[None, :, None, None] * (v - m[None, :, None, None])
            / jnp.sqrt(var[None, :, None, None] + eps) + b[None, :, None, None])


def _conv_ref(x, w, stride, padding, groups):
    dn = jax.lax.conv_dimension_numbers(x.shape, w.shape, ("NCHW", "OIHW", "NCHW"))
    return jax.lax.conv_general_dilated(x, w, (stride, stride), padding,
                                        dimension_numbers=dn,
                                        feature_group_count=groups)


def shufflenet_unit_b_reference(x, p, groups=GROUPS):
    Cb = p["w1"].shape[0]
    out = _conv_ref(x, p["w1"], 1, "VALID", groups) + p["b1"][None, :, None, None]
    out = jax.nn.relu(_bn_ref(out, p["g2"], p["beta2"], p["m2"], p["v2"]))
    B, C, H, W = out.shape
    out = out.reshape(B, groups, C // groups, H, W)
    out = jnp.transpose(out, (0, 2, 1, 3, 4)).reshape(B, C, H, W)   # shuffle
    out = _conv_ref(out, p["w3"], 2, ((1, 1), (1, 1)), Cb) + p["b3"][None, :, None, None]
    out = _bn_ref(out, p["g4"], p["beta4"], p["m4"], p["v4"])
    out = _conv_ref(out, p["w5"], 1, "VALID", groups) + p["b5"][None, :, None, None]
    out = _bn_ref(out, p["g6"], p["beta6"], p["m6"], p["v6"])
    pooled = jax.lax.reduce_window(x, 0.0, jax.lax.add, (1, 1, 3, 3), (1, 1, 2, 2),
                                   ((0, 0), (0, 0), (1, 1), (1, 1))) / 9.0
    return jax.nn.relu(jnp.concatenate([pooled, out], axis=1))


if __name__ == "__main__":
    B, Cin, H, W = 2, 12, 16, 16
    OUT_CHANNELS = 36                       # total out = 12 (pooled x) + 24 (branch)

    key = jax.random.PRNGKey(0)
    k_params, k_x = jax.random.split(key)
    params = init_params(k_params, Cin, OUT_CHANNELS, GROUPS)
    x = jax.random.normal(k_x, (B, Cin, H, W), jnp.float32)

    fwd = jax.jit(shufflenet_unit_b_pallas, static_argnames=("groups",))
    y = jax.block_until_ready(fwd(x, params))

    y_ref = shufflenet_unit_b_reference(x, params, GROUPS)
    np.testing.assert_allclose(np.asarray(y), np.asarray(y_ref), rtol=2e-4, atol=2e-4)
    assert y.shape == (B, OUT_CHANNELS, H // 2, W // 2)

    print("KERNEL_OK")
</pallas_src>

<mosaic_0001>
module attributes {stable_mosaic.version = 11 : i64} {
  func.func @_shufflenet_b_kernel(%arg0: i32, %arg1: memref<1x576x13xf32, #tpu.memory_space<vmem>>, %arg2: memref<13x18xf32, #tpu.memory_space<vmem>>, %arg3: memref<9x18xf32, #tpu.memory_space<vmem>>, %arg4: memref<18x36xf32, #tpu.memory_space<vmem>>, %arg5: memref<1x36xf32, #tpu.memory_space<vmem>>, %arg6: memref<1x64x36xf32, #tpu.memory_space<vmem>>, %arg7: memref<36x16x18xf32, #tpu.memory_space<vmem>>) attributes {dimension_semantics = [#tpu.dimension_semantics<parallel>], iteration_bounds = array<i64: 2>, scalar_prefetch = 0 : i64, scratch_operands = 1 : i64, tpu.core_type = #tpu.core_type<tc>, window_params = [{transform_indices = @transform_0, window_bounds = array<i64: 1, 576, 13>}, {pipeline_mode = #tpu.pipeline_mode<synchronous>, transform_indices = @transform_1, window_bounds = array<i64: 13, 18>}, {pipeline_mode = #tpu.pipeline_mode<synchronous>, transform_indices = @transform_2, window_bounds = array<i64: 9, 18>}, {pipeline_mode = #tpu.pipeline_mode<synchronous>, transform_indices = @transform_3, window_bounds = array<i64: 18, 36>}, {pipeline_mode = #tpu.pipeline_mode<synchronous>, transform_indices = @transform_4, window_bounds = array<i64: 1, 36>}, {transform_indices = @transform_5, window_bounds = array<i64: 1, 64, 36>}]} {
    %c0 = arith.constant 0 : index
    %c0_0 = arith.constant 0 : index
    %c0_1 = arith.constant 0 : index
    %0 = vector.load %arg1[%c0, %c0_0, %c0_1] : memref<1x576x13xf32, #tpu.memory_space<vmem>>, vector<1x576x13xf32>
    %1 = vector.shape_cast %0 : vector<1x576x13xf32> to vector<576x13xf32>
    %c0_2 = arith.constant 0 : index
    %c0_3 = arith.constant 0 : index
    %2 = vector.load %arg2[%c0_2, %c0_3] : memref<13x18xf32, #tpu.memory_space<vmem>>, vector<13x18xf32>
    %cst = arith.constant dense<0.000000e+00> : vector<576x18xf32>
    %3 = tpu.matmul %1, %2, %cst {dimension_numbers = #tpu.dot_dimension_numbers<[1], [0], [0], [1], [0, 0, 1, 1], [], []>} : vector<576x13xf32>, vector<13x18xf32>, vector<576x18xf32> -> vector<576x18xf32>
    %4 = tpu.iota {dimensions = array<i32: 1>} : vector<1x18xi32>
    %c12_i32 = arith.constant 12 : i32
    %5 = vector.broadcast %c12_i32 : i32 to vector<1x18xi32>
    %6 = arith.cmpi slt, %4, %5 : vector<1x18xi32>
    %cst_4 = arith.constant -3.40282347E+38 : f32
    %cst_5 = arith.constant 0.000000e+00 : f32
    %7 = vector.broadcast %cst_4 : f32 to vector<1x18xf32>
    %8 = vector.broadcast %cst_5 : f32 to vector<1x18xf32>
    %9 = arith.select %6, %7, %8 : vector<1x18xi1>, vector<1x18xf32>
    %10 = vector.broadcast %9 : vector<1x18xf32> to vector<576x18xf32>
    %11 = arith.maximumf %3, %10 : vector<576x18xf32>
    %12 = vector.shape_cast %11 : vector<576x18xf32> to vector<36x16x18xf32>
    %c0_6 = arith.constant 0 : index
    %c0_7 = arith.constant 0 : index
    %c0_8 = arith.constant 0 : index
    %13 = vector.load %arg7[%c0_6, %c0_7, %c0_8] : memref<36x16x18xf32, #tpu.memory_space<vmem>>, vector<36x16x18xf32>
    tpu.vector_store %arg7[%c0_6, %c0_7, %c0_8], %12 {strides = array<i32>} : memref<36x16x18xf32, #tpu.memory_space<vmem>>, vector<36x16x18xf32>,
    %c0_9 = arith.constant 0 : index
    %c0_10 = arith.constant 0 : index
    %14 = vector.load %arg3[%c0_9, %c0_10] : memref<9x18xf32, #tpu.memory_space<vmem>>, vector<9x18xf32>
    %15 = vector.extract_strided_slice %14 {offsets = [0, 0], sizes = [1, 18], strides = [1, 1]} : vector<9x18xf32> to vector<1x18xf32>
    %16 = vector.shape_cast %15 : vector<1x18xf32> to vector<1x1x18xf32>
    %17 = vector.extract_strided_slice %14 {offsets = [1, 0], sizes = [1, 18], strides = [1, 1]} : vector<9x18xf32> to vector<1x18xf32>
    %18 = vector.shape_cast %17 : vector<1x18xf32> to vector<1x1x18xf32>
    %19 = vector.extract_strided_slice %14 {offsets = [2, 0], sizes = [1, 18], strides = [1, 1]} : vector<9x18xf32> to vector<1x18xf32>
    %20 = vector.shape_cast %19 : vector<1x18xf32> to vector<1x1x18xf32>
    %21 = vector.extract_strided_slice %14 {offsets = [3, 0], sizes = [1, 18], strides = [1, 1]} : vector<9x18xf32> to vector<1x18xf32>
    %22 = vector.shape_cast %21 : vector<1x18xf32> to vector<1x1x18xf32>
    %23 = vector.extract_strided_slice %14 {offsets = [4, 0], sizes = [1, 18], strides = [1, 1]} : vector<9x18xf32> to vector<1x18xf32>
    %24 = vector.shape_cast %23 : vector<1x18xf32> to vector<1x1x18xf32>
    %25 = vector.extract_strided_slice %14 {offsets = [5, 0], sizes = [1, 18], strides = [1, 1]} : vector<9x18xf32> to vector<1x18xf32>
    %26 = vector.shape_cast %25 : vector<1x18xf32> to vector<1x1x18xf32>
    %27 = vector.extract_strided_slice %14 {offsets = [6, 0], sizes = [1, 18], strides = [1, 1]} : vector<9x18xf32> to vector<1x18xf32>
    %28 = vector.shape_cast %27 : vector<1x18xf32> to vector<1x1x18xf32>
    %29 = vector.extract_strided_slice %14 {offsets = [7, 0], sizes = [1, 18], strides = [1, 1]} : vector<9x18xf32> to vector<1x18xf32>
    %30 = vector.shape_cast %29 : vector<1x18xf32> to vector<1x1x18xf32>
    %31 = vector.extract_strided_slice %14 {offsets = [8, 0], sizes = [1, 18], strides = [1, 1]} : vector<9x18xf32> to vector<1x18xf32>
    %32 = vector.shape_cast %31 : vector<1x18xf32> to vector<1x1x18xf32>
    %cst_11 = arith.constant 0.000000e+00 : f32
    %33 = vector.broadcast %cst_11 : f32 to vector<8x8x18xf32>
    %c0_12 = arith.constant 0 : index
    %c0_13 = arith.constant 0 : index
    %c0_14 = arith.constant 0 : index
    %34 = vector.load %arg7[%c0_12, %c0_13, %c0_14] : memref<36x16x18xf32, #tpu.memory_space<vmem>>, vector<8x8x18xf32>
    %35 = vector.broadcast %16 : vector<1x1x18xf32> to vector<8x8x18xf32>
    %36 = arith.mulf %34, %35 : vector<8x8x18xf32>
    %37 = arith.addf %33, %36 : vector<8x8x18xf32>
    %c9 = arith.constant 9 : index
    %c0_15 = arith.constant 0 : index
    %c0_16 = arith.constant 0 : index
    %38 = vector.load %arg7[%c9, %c0_15, %c0_16] : memref<36x16x18xf32, #tpu.memory_space<vmem>>, vector<8x8x18xf32>
    %39 = vector.broadcast %18 : vector<1x1x18xf32> to vector<8x8x18xf32>
    %40 = arith.mulf %38, %39 : vector<8x8x18xf32>
    %41 = arith.addf %37, %40 : vector<8x8x18xf32>
    %c0_17 = arith.constant 0 : index
    %c1 = arith.constant 1 : index
    %c0_18 = arith.constant 0 : index
    %42 = vector.load %arg7[%c0_17, %c1, %c0_18] : memref<36x16x18xf32, #tpu.memory_space<vmem>>, vector<8x8x18xf32>
    %43 = vector.broadcast %20 : vector<1x1x18xf32> to vector<8x8x18xf32>
    %44 = arith.mulf %42, %43 : vector<8x8x18xf32>
    %45 = arith.addf %41, %44 : vector<8x8x18xf32>
    %c18 = arith.constant 18 : index
    %c0_19 = arith.constant 0 : index
    %c0_20 = arith.constant 0 : index
    %46 = vector.load %arg7[%c18, %c0_19, %c0_20] : memref<36x16x18xf32, #tpu.memory_space<vmem>>, vector<8x8x18xf32>
    %47 = vector.broadcast %22 : vector<1x1x18xf32> to vector<8x8x18xf32>
    %48 = arith.mulf %46, %47 : vector<8x8x18xf32>
    %49 = arith.addf %45, %48 : vector<8x8x18xf32>
    %c27 = arith.constant 27 : index
    %c0_21 = arith.constant 0 : index
    %c0_22 = arith.constant 0 : index
    %50 = vector.load %arg7[%c27, %c0_21, %c0_22] : memref<36x16x18xf32, #tpu.memory_space<vmem>>, vector<8x8x18xf32>
    %51 = vector.broadcast %24 : vector<1x1x18xf32> to vector<8x8x18xf32>
    %52 = arith.mulf %50, %51 : vector<8x8x18xf32>
    %53 = arith.addf %49, %52 : vector<8x8x18xf32>
    %c18_23 = arith.constant 18 : index
    %c1_24 = arith.constant 1 : index
    %c0_25 = arith.constant 0 : index
    %54 = vector.load %arg7[%c18_23, %c1_24, %c0_25] : memref<36x16x18xf32, #tpu.memory_space<vmem>>, vector<8x8x18xf32>
    %55 = vector.broadcast %26 : vector<1x1x18xf32> to vector<8x8x18xf32>
    %56 = arith.mulf %54, %55 : vector<8x8x18xf32>
    %57 = arith.addf %53, %56 : vector<8x8x18xf32>
    %c1_26 = arith.constant 1 : index
    %c0_27 = arith.constant 0 : index
    %c0_28 = arith.constant 0 : index
    %58 = vector.load %arg7[%c1_26, %c0_27, %c0_28] : memref<36x16x18xf32, #tpu.memory_space<vmem>>, vector<8x8x18xf32>
    %59 = vector.broadcast %28 : vector<1x1x18xf32> to vector<8x8x18xf32>
    %60 = arith.mulf %58, %59 : vector<8x8x18xf32>
    %61 = arith.addf %57, %60 : vector<8x8x18xf32>
    %c10 = arith.constant 10 : index
    %c0_29 = arith.constant 0 : index
    %c0_30 = arith.constant 0 : index
    %62 = vector.load %arg7[%c10, %c0_29, %c0_30] : memref<36x16x18xf32, #tpu.memory_space<vmem>>, vector<8x8x18xf32>
    %63 = vector.broadcast %30 : vector<1x1x18xf32> to vector<8x8x18xf32>
    %64 = arith.mulf %62, %63 : vector<8x8x18xf32>
    %65 = arith.addf %61, %64 : vector<8x8x18xf32>
    %c1_31 = arith.constant 1 : index
    %c1_32 = arith.constant 1 : index
    %c0_33 = arith.constant 0 : index
    %66 = vector.load %arg7[%c1_31, %c1_32, %c0_33] : memref<36x16x18xf32, #tpu.memory_space<vmem>>, vector<8x8x18xf32>
    %67 = vector.broadcast %32 : vector<1x1x18xf32> to vector<8x8x18xf32>
    %68 = arith.mulf %66, %67 : vector<8x8x18xf32>
    %69 = arith.addf %65, %68 : vector<8x8x18xf32>
    %70 = vector.shape_cast %69 : vector<8x8x18xf32> to vector<64x18xf32>
    %c0_34 = arith.constant 0 : index
    %c0_35 = arith.constant 0 : index
    %71 = vector.load %arg4[%c0_34, %c0_35] : memref<18x36xf32, #tpu.memory_space<vmem>>, vector<18x36xf32>
    %cst_36 = arith.constant dense<0.000000e+00> : vector<64x36xf32>
    %72 = tpu.matmul %70, %71, %cst_36 {dimension_numbers = #tpu.dot_dimension_numbers<[1], [0], [0], [1], [0, 0, 1, 1], [], []>} : vector<64x18xf32>, vector<18x36xf32>, vector<64x36xf32> -> vector<64x36xf32>
    %c0_37 = arith.constant 0 : index
    %c0_38 = arith.constant 0 : index
    %73 = vector.load %arg5[%c0_37, %c0_38] : memref<1x36xf32, #tpu.memory_space<vmem>>, vector<1x36xf32>
    %74 = vector.broadcast %73 : vector<1x36xf32> to vector<64x36xf32>
    %75 = arith.addf %72, %74 : vector<64x36xf32>
    %cst_39 = arith.constant 0.000000e+00 : f32
    %76 = vector.broadcast %cst_39 : f32 to vector<64x36xf32>
    %77 = arith.maximumf %75, %76 : vector<64x36xf32>
    %78 = vector.shape_cast %77 : vector<64x36xf32> to vector<1x64x36xf32>
    %c0_40 = arith.constant 0 : index
    %c0_41 = arith.constant 0 : index
    %c0_42 = arith.constant 0 : index
    %79 = vector.load %arg6[%c0_40, %c0_41, %c0_42] : memref<1x64x36xf32, #tpu.memory_space<vmem>>, vector<1x64x36xf32>
    tpu.vector_store %arg6[%c0_40, %c0_41, %c0_42], %78 {strides = array<i32>} : memref<1x64x36xf32, #tpu.memory_space<vmem>>, vector<1x64x36xf32>,
    return
  }
  func.func @transform_0(%arg0: i32) -> (i32, i32, i32) {
    %c0_i32 = arith.constant 0 : i32
    %c0_i32_0 = arith.constant 0 : i32
    %c0_i32_1 = arith.constant 0 : i32
    return %arg0, %c0_i32, %c0_i32_0 : i32, i32, i32
  }
  func.func @transform_1(%arg0: i32) -> (i32, i32) {
    %c0_i32 = arith.constant 0 : i32
    %c0_i32_0 = arith.constant 0 : i32
    %c0_i32_1 = arith.constant 0 : i32
    return %c0_i32, %c0_i32_0 : i32, i32
  }
  func.func @transform_2(%arg0: i32) -> (i32, i32) {
    %c0_i32 = arith.constant 0 : i32
    %c0_i32_0 = arith.constant 0 : i32
    %c0_i32_1 = arith.constant 0 : i32
    return %c0_i32, %c0_i32_0 : i32, i32
  }
  func.func @transform_3(%arg0: i32) -> (i32, i32) {
    %c0_i32 = arith.constant 0 : i32
    %c0_i32_0 = arith.constant 0 : i32
    %c0_i32_1 = arith.constant 0 : i32
    return %c0_i32, %c0_i32_0 : i32, i32
  }
  func.func @transform_4(%arg0: i32) -> (i32, i32) {
    %c0_i32 = arith.constant 0 : i32
    %c0_i32_0 = arith.constant 0 : i32
    %c0_i32_1 = arith.constant 0 : i32
    return %c0_i32, %c0_i32_0 : i32, i32
  }
  func.func @transform_5(%arg0: i32) -> (i32, i32, i32) {
    %c0_i32 = arith.constant 0 : i32
    %c0_i32_0 = arith.constant 0 : i32
    %c0_i32_1 = arith.constant 0 : i32
    return %arg0, %c0_i32, %c0_i32_0 : i32, i32, i32
  }
}

</mosaic_0001>

<bundles_post_ra>
// kernel: shufflenet_unit_b_pallas.1
= control target key start
LH: loop header
LB: loop body
LE: loop exit
PB: predicated region body
PF: predicated region fallthrough
CT: control target
= control target key end

     0   :  { %10 = vsyncpa [#allocation4], 0  ;;  %s2629_s0 = inlined_call_operand.vmem [shape: f32[2,576,13], index: 0, kind: input, shape index: {}]   ;;  %s2630_s1 = inlined_call_operand.vmem [shape: f32[13,18], index: 1, kind: input, shape index: {}]   ;;  %s2631_s2 = inlined_call_operand.vmem [shape: f32[9,18], index: 2, kind: input, shape index: {}]   ;;  %s2632_s3 = inlined_call_operand.vmem [shape: f32[18,36], index: 3, kind: input, shape index: {}]   ;;  %s2633_s4 = inlined_call_operand.vmem [shape: f32[1,36], index: 4, kind: input, shape index: {}]   ;;  %s2634_s5 = inlined_call_operand.hbm [shape: f32[2,64,36], index: 5, kind: output, shape index: {}]  }
   0x1   :  { %12 = vsyncpa [#allocation4 + $0x1], 0  ;;  %s2041_s18 = smov 0   ;;  %s2043_s19 = smov 0  }
   0x2   :  { %s2045_s20 = smov 0   ;;  %s2047_s21 = smov 0  }
   0x3 LB: > { %s2062_s22 = sadd.s32 4294967295, %s2005_s21   ;;  %s1587_s23 = sadd.s32 4294967294, %s2005_s21   ;;  %s2005_s21 = sphi %s2047_s21, %s2649_s21   ;;  %s2001_s20 = sphi %s2045_s20, %s2648_s20   ;;  %s1997_s19 = sphi %s2043_s19, %s2647_s19   ;;  %s1993_s18 = sphi %s2041_s18, %s2646_s18  }
   0x4   : > { %s2066_s24 = sadd.s32 1, %s2005_s21   ;;  %s135_s25 = sadd.s32 1, %s2001_s20 }
   0x5   : > { %s132_s26 = ssub.s32 %s2005_s21, %s2066_s24  ;;  %p145_p0 = scmp.ne.s32.totalorder %s2001_s20, %s1997_s19 }
   0x6   : > { %p133_p1 = scmp.eq.s32.totalorder %s132_s26, 0  ;;  %p146_p2 = scmp.eq.s32.totalorder %s2062_s22, 1 }
   0x7   : > { %p151_p3 = scmp.ne.s32.totalorder %s1997_s19, %s1993_s18  ;;  %p152_p4 = scmp.eq.s32.totalorder %s1587_s23, 1 }
   0x8   : > { %s2077_s27 = scalar_select %p133_p1, %s2001_s20, %s135_s25  }
   0x9   : > { %p2079_p5 = por %p146_p2, %p145_p0  ;;  %p2083_p6 = por %p152_p4, %p151_p3 }
   0xa   : > { %p1590_p7 = scmp.ge.s32.totalorder %s2005_s21, 1  ;;  %p190_p8 = scmp.lt.s32.totalorder %s2005_s21, 3 }
   0xc   : > { %p191_p9 = pnand %p1590_p7, %p190_p8 }
   0xe   : > { %194 = sbr.rel (%p191_p9) target bundleno = 548 (0x224), region = 40 }
  0x13   : > { %v296_v0 = vld [vmem:[%s2630_s1 + $0x8] sm:$0x1f]  ;;  %vm514_vm0 = vcmask 1044480   ;;  %v295_v1 = vld [vmem:[%s2630_s1] sm:$0xff]  ;;  %p218_p10 = scmp.lt.s32.totalorder %s2062_s22, 1  ;;  %vm297_vm1 = vcmask 105472  }
  0x14   : > { %1768 = vmatprep.subr.msk.mxu0 %vm514_vm0, %v296_v0  ;;  %1898 = vmatprep.subr.msk.mxu1 %vm514_vm0, %v296_v0  ;;  %vm1385_vm2 = vcmask 1041408   ;;  %vm1019_vm4 = vcmask 146432   ;;  %s215_s8 = sand.u32 1, %s1997_s19   ;;  %vm1502_vm5 = vcmask 293888   ;;  %s2008_s25 = smov [#allocation3]  }
  0x15   : > { %1769 = vmatpush3.msk.msra.mxu0 %vm514_vm0, %v296_v0  ;;  %s219_s9 = scalar_select %p218_p10, %s2062_s22, 1  ;;  %1900 = vmatpush3.msk.msra.mxu1 %vm514_vm0, %v296_v0 }
  0x16   : > { %1770 = vmatprep.subr.mxu0 %v295_v1  ;;  %1899 = vmatprep.subr.mxu1 %v295_v1  ;;  %s1591_s11 = sshll.u32 %s215_s8, 6  ;;  %s1949_s26 = sshll.u32 %s2008_s25, 4  ;;  %s1950_s26 = int_to_ptr.vmem [resolvable:$false] %s1949_s26 }
  0x17   : > { %1771 = vmatpush3.msra.mxu0 %v295_v1  ;;  %s1902_s10 = smul.u32 576, %s219_s9  ;;  %1901 = vmatpush3.msra.mxu1 %v295_v1  ;;  %s217_s12 = scalar_lea.vmem [#allocation3], %s1591_s11 }
  0x18   : > { %s1525_s14 = sshll.u32 %s217_s12, 4  ;;  %s1951_s30 = scalar_lea.vmem %s1950_s26, 2048  ;;  %s2583_s14 = int_to_ptr.vmem [resolvable:$true] %s1525_s14 }
  0x19   : > { %s2100_s13 = scalar_lea.vmem %s2629_s0, %s1902_s10  ;;  %s1945_s23 = scalar_lea.vmem %s2583_s14, 1024 }
  0x1a   : > { %v223_v2 = vld [vmem:[%s2100_s13] sm:$0xff]  ;;  %v224_v3 = vld [vmem:[%s2100_s13 + $0x8] sm:$0xff]  ;;  %v225_v4 = vld [vmem:[%s2100_s13 + $0x10] sm:$0xff]  ;;  %p1946_p11 = scmp.ne.s32.totalorder %s2583_s14, %s1945_s23  ;;  %p1952_p0 = scmp.lt.s32.totalorder %s2583_s14, %s1950_s26 }
  0x1b   : > { %1772 = vmatprep.mubr.msk.f32.mxu0 %vm297_vm1, %v223_v2  ;;  %v263_v5 = vld [vmem:[%s2100_s13 + $0x140] sm:$0xff]  ;;  %v226_v6 = vld [vmem:[%s2100_s13 + $0x18] sm:$0xff]  ;;  %v264_v7 = vld [vmem:[%s2100_s13 + $0x148] sm:$0xff]  ;;  %p1953_p1 = scmp.lt.s32.totalorder %s1951_s30, %s1945_s23 }
  0x1c   : > { %1773 = vmatmul.mubr.msk.f32.vlgmr.msra.gmra.mxu0 %vm297_vm1, %v224_v3  ;;  %1832 = vmatprep.mubr.msk.f32.mxu1 %vm297_vm1, %v263_v5  ;;  %v227_v8 = vld [vmem:[%s2100_s13 + $0x20] sm:$0xff]  ;;  %v265_v9 = vld [vmem:[%s2100_s13 + $0x150] sm:$0xff]  ;;  %v266_v10 = vld [vmem:[%s2100_s13 + $0x158] sm:$0xff]  ;;  %p1947_p12 = pnand %p1946_p11, %p2079_p5 }
  0x1d   : > { %1775 = vmatprep.mubr.msk.f32.mxu0 %vm297_vm1, %v225_v4  ;;  %1833 = vmatmul.mubr.msk.f32.vlgmr.msra.gmra.mxu1 %vm297_vm1, %v264_v7  ;;  %v267_v11 = vld [vmem:[%s2100_s13 + $0x160] sm:$0xff]  ;;  %v228_v12 = vld [vmem:[%s2100_s13 + $0x28] sm:$0xff]  ;;  %v229_v13 = vld [vmem:[%s2100_s13 + $0x30] sm:$0xff]  ;;  %p1954_p2 = por %p1953_p1, %p1952_p0 }
  0x1e   : > { %1835 = vmatprep.mubr.msk.f32.mxu1 %vm297_vm1, %v265_v9  ;;  %v268_v14 = vld [vmem:[%s2100_s13 + $0x168] sm:$0xff]  ;;  %v269_v15 = vld [vmem:[%s2100_s13 + $0x170] sm:$0xff]  ;;  %v230_v16 = vld [vmem:[%s2100_s13 + $0x38] sm:$0xff]  ;;  %p1948_p13 = pneg %p1947_p12 }
  0x1f   : > { %v231_v17 = vld [vmem:[%s2100_s13 + $0x40] sm:$0xff]  ;;  %v270_v18 = vld [vmem:[%s2100_s13 + $0x178] sm:$0xff]  ;;  %v232_v20 = vld [vmem:[%s2100_s13 + $0x48] sm:$0xff] }
  0x20   : > { %1776 = vmatmul.mubr.msk.f32.gmra.mxu0 %vm297_vm1, %v226_v6  ;;  %v271_v19 = vld [vmem:[%s2100_s13 + $0x180] sm:$0xff]  ;;  %v233_v21 = vld [vmem:[%s2100_s13 + $0x50] sm:$0xff]  ;;  %v272_v22 = vld [vmem:[%s2100_s13 + $0x188] sm:$0xff]  ;;  %p1955_p3 = pnand %p1954_p2, %p1948_p13 }
  0x21   : > { %1778 = vmatprep.mubr.msk.f32.mxu0 %vm297_vm1, %v227_v8  ;;  %1836 = vmatmul.mubr.msk.f32.gmra.mxu1 %vm297_vm1, %v266_v10  ;;  %v273_v23 = vld [vmem:[%s2100_s13 + $0x190] sm:$0xff]  ;;  %v234_v24 = vld [vmem:[%s2100_s13 + $0x58] sm:$0xff]  ;;  %v235_v25 = vld [vmem:[%s2100_s13 + $0x60] sm:$0xff] }
  0x22   : > { %1838 = vmatprep.mubr.msk.f32.mxu1 %vm297_vm1, %v267_v11  ;;  %v274_v26 = vld [vmem:[%s2100_s13 + $0x198] sm:$0xff]  ;;  %v275_v27 = vld [vmem:[%s2100_s13 + $0x1a0] sm:$0xff]  ;;  %v236_v28 = vld [vmem:[%s2100_s13 + $0x68] sm:$0xff] }
  0x23   : > { %v237_v29 = vld [vmem:[%s2100_s13 + $0x70] sm:$0xff]  ;;  %v276_v30 = vld [vmem:[%s2100_s13 + $0x1a8] sm:$0xff]  ;;  %v238_v32 = vld [vmem:[%s2100_s13 + $0x78] sm:$0xff] }
  0x24   : > { %1779 = vmatmul.mubr.msk.f32.gmra.mxu0 %vm297_vm1, %v228_v12  ;;  %v277_v31 = vld [vmem:[%s2100_s13 + $0x1b0] sm:$0xff]  ;;  %v239_v33 = vld [vmem:[%s2100_s13 + $0x80] sm:$0xff]  ;;  %v278_v34 = vld [vmem:[%s2100_s13 + $0x1b8] sm:$0xff] }
  0x25   : > { %1781 = vmatprep.mubr.msk.f32.mxu0 %vm297_vm1, %v229_v13  ;;  %1839 = vmatmul.mubr.msk.f32.gmra.mxu1 %vm297_vm1, %v268_v14  ;;  %v279_v35 = vld [vmem:[%s2100_s13 + $0x1c0] sm:$0xff]  ;;  %v240_v36 = vld [vmem:[%s2100_s13 + $0x88] sm:$0xff]  ;;  %v241_v37 = vld [vmem:[%s2100_s13 + $0x90] sm:$0xff]  ;;  %v943_v13 = vlaneseq }
  0x26   : > { %1841 = vmatprep.mubr.msk.f32.mxu1 %vm297_vm1, %v269_v15  ;;  %v280_v38 = vld [vmem:[%s2100_s13 + $0x1c8] sm:$0xff]  ;;  %v281_v39 = vld [vmem:[%s2100_s13 + $0x1d0] sm:$0xff]  ;;  %v242_v40 = vld [vmem:[%s2100_s13 + $0x98] sm:$0xff]  ;;  %v2007_v15 = vmov 0.0  }
  0x27   : > { %v243_v41 = vld [vmem:[%s2100_s13 + $0xa0] sm:$0xff]  ;;  %v282_v42 = vld [vmem:[%s2100_s13 + $0x1d8] sm:$0xff]  ;;  %v244_v44 = vld [vmem:[%s2100_s13 + $0xa8] sm:$0xff]  ;;  %v944_v14 = vand.u32 127, %v943_v13 }
  0x28   : > { %1782 = vmatmul.mubr.msk.f32.gmra.mxu0 %vm297_vm1, %v230_v16  ;;  %v283_v43 = vld [vmem:[%s2100_s13 + $0x1e0] sm:$0xff]  ;;  %v245_v45 = vld [vmem:[%s2100_s13 + $0xb0] sm:$0xff]  ;;  %v284_v46 = vld [vmem:[%s2100_s13 + $0x1e8] sm:$0xff] }
  0x29   : > { %1784 = vmatprep.mubr.msk.f32.mxu0 %vm297_vm1, %v231_v17  ;;  %1842 = vmatmul.mubr.msk.f32.gmra.mxu1 %vm297_vm1, %v270_v18  ;;  %v285_v47 = vld [vmem:[%s2100_s13 + $0x1f0] sm:$0xff]  ;;  %v246_v48 = vld [vmem:[%s2100_s13 + $0xb8] sm:$0xff]  ;;  %v247_v49 = vld [vmem:[%s2100_s13 + $0xc0] sm:$0xff]  ;;  %vm945_vm3 = vcmp.lt.s32.totalorder %v944_v14, 12 }
  0x2a   : > { %1844 = vmatprep.mubr.msk.f32.mxu1 %vm297_vm1, %v271_v19  ;;  %v286_v50 = vld [vmem:[%s2100_s13 + $0x1f8] sm:$0xff]  ;;  %v287_v51 = vld [vmem:[%s2100_s13 + $0x200] sm:$0xff]  ;;  %v248_v52 = vld [vmem:[%s2100_s13 + $0xc8] sm:$0xff]  ;;  %v2256_v16 = vsel %vm945_vm3, -3.4028235e+38, %v2007_v15 }
  0x2b   : > { %v249_v53 = vld [vmem:[%s2100_s13 + $0xd0] sm:$0xff]  ;;  %v288_v54 = vld [vmem:[%s2100_s13 + $0x208] sm:$0xff]  ;;  %v250_v56 = vld [vmem:[%s2100_s13 + $0xd8] sm:$0xff] }
  0x2c   : > { %1785 = vmatmul.mubr.msk.f32.gmra.mxu0 %vm297_vm1, %v232_v20  ;;  %v289_v55 = vld [vmem:[%s2100_s13 + $0x210] sm:$0xff]  ;;  %v251_v57 = vld [vmem:[%s2100_s13 + $0xe0] sm:$0xff]  ;;  %v290_v58 = vld [vmem:[%s2100_s13 + $0x218] sm:$0xff] }
  0x2d   : > { %1787 = vmatprep.mubr.msk.f32.mxu0 %vm297_vm1, %v233_v21  ;;  %1845 = vmatmul.mubr.msk.f32.gmra.mxu1 %vm297_vm1, %v272_v22  ;;  %v291_v59 = vld [vmem:[%s2100_s13 + $0x220] sm:$0xff]  ;;  %v252_v60 = vld [vmem:[%s2100_s13 + $0xe8] sm:$0xff]  ;;  %v253_v61 = vld [vmem:[%s2100_s13 + $0xf0] sm:$0xff] }
  0x2e   : > { %1847 = vmatprep.mubr.msk.f32.mxu1 %vm297_vm1, %v273_v23  ;;  %v292_v62 = vld [vmem:[%s2100_s13 + $0x228] sm:$0xff]  ;;  %v254_v63 = vld [vmem:[%s2100_s13 + $0xf8] sm:$0xff]  ;;  %v255_v0 = vld [vmem:[%s2100_s13 + $0x100] sm:$0xff] }
  0x2f   : > { %v256_v1 = vld [vmem:[%s2100_s13 + $0x108] sm:$0xff]  ;;  %v257_v2 = vld [vmem:[%s2100_s13 + $0x110] sm:$0xff]  ;;  %v258_v3 = vld [vmem:[%s2100_s13 + $0x118] sm:$0xff] }
  0x30   : > { %1788 = vmatmul.mubr.msk.f32.gmra.mxu0 %vm297_vm1, %v234_v24  ;;  %v259_v4 = vld [vmem:[%s2100_s13 + $0x120] sm:$0xff]  ;;  %v260_v5 = vld [vmem:[%s2100_s13 + $0x128] sm:$0xff]  ;;  %v261_v6 = vld [vmem:[%s2100_s13 + $0x130] sm:$0xff] }
  0x31   : > { %1790 = vmatprep.mubr.msk.f32.mxu0 %vm297_vm1, %v235_v25  ;;  %1848 = vmatmul.mubr.msk.f32.gmra.mxu1 %vm297_vm1, %v274_v26  ;;  %v262_v7 = vld [vmem:[%s2100_s13 + $0x138] sm:$0xff]  ;;  %v1353_v8 = vld [vmem:[%s2632_s3 + $0x10] sm:$0x3]  ;;  %v1352_v9 = vld [vmem:[%s2632_s3 + $0x8] sm:$0xff] }
  0x32   : > { %1850 = vmatprep.mubr.msk.f32.mxu1 %vm297_vm1, %v275_v27  ;;  %1880 = vmatprep.subr.msk.mxu1 %vm1385_vm2, %v1353_v8  ;;  %v1351_v10 = vld [vmem:[%s2632_s3] sm:$0xff]  ;;  %v293_v11 = vld [vmem:[%s2100_s13 + $0x230] sm:$0xff]  ;;  %v294_v12 = vld [vmem:[%s2100_s13 + $0x238] sm:$0xff]  ;;  %s1682_s13 = sshll.u32 %s2062_s22, 10  ;;  %s2589_s22 = scalar_lea.sflag [#allocation4], %s215_s8 }
  0x33   : > { %1881 = vmatpush3.msk.msra.mxu1 %vm1385_vm2, %v1353_v8  ;;  %s2581_s17 = scalar_lea.hbm %s2634_s5, %s1682_s13 }
  0x34   : > { %1791 = vmatmul.mubr.msk.f32.gmra.mxu0 %vm297_vm1, %v236_v28  ;;  %1882 = vmatprep.subr.mxu1 %v1352_v9 }
  0x35   : > { %1793 = vmatprep.mubr.msk.f32.mxu0 %vm297_vm1, %v237_v29  ;;  %1851 = vmatmul.mubr.msk.f32.gmra.mxu1 %vm297_vm1, %v276_v30 }
  0x36   : > { %1853 = vmatprep.mubr.msk.f32.mxu1 %vm297_vm1, %v277_v31  ;;  %1883 = vmatpush3.msra.mxu1 %v1352_v9 }
  0x37   : > { %1884 = vmatprep.subr.mxu1 %v1351_v10 }
  0x38   : > { %1794 = vmatmul.mubr.msk.f32.gmra.mxu0 %vm297_vm1, %v238_v32  ;;  %1885 = vmatpush3.msra.mxu1 %v1351_v10 }
  0x39   : > { %1796 = vmatprep.mubr.msk.f32.mxu0 %vm297_vm1, %v239_v33  ;;  %1854 = vmatmul.mubr.msk.f32.gmra.mxu1 %vm297_vm1, %v278_v34 }
  0x3a   : > { %1856 = vmatprep.mubr.msk.f32.mxu1 %vm297_vm1, %v279_v35 }
  0x3c   : > { %1797 = vmatmul.mubr.msk.f32.gmra.mxu0 %vm297_vm1, %v240_v36 }
  0x3d   : > { %1799 = vmatprep.mubr.msk.f32.mxu0 %vm297_vm1, %v241_v37  ;;  %1857 = vmatmul.mubr.msk.f32.gmra.mxu1 %vm297_vm1, %v280_v38 }
  0x3e   : > { %1859 = vmatprep.mubr.msk.f32.mxu1 %vm297_vm1, %v281_v39 }
  0x40   : > { %1800 = vmatmul.mubr.msk.f32.gmra.mxu0 %vm297_vm1, %v242_v40 }
  0x41   : > { %1802 = vmatprep.mubr.msk.f32.mxu0 %vm297_vm1, %v243_v41  ;;  %1860 = vmatmul.mubr.msk.f32.gmra.mxu1 %vm297_vm1, %v282_v42 }
  0x42   : > { %1862 = vmatprep.mubr.msk.f32.mxu1 %vm297_vm1, %v283_v43 }
  0x44   : > { %1803 = vmatmul.mubr.msk.f32.gmra.mxu0 %vm297_vm1, %v244_v44 }
  0x45   : > { %1805 = vmatprep.mubr.msk.f32.mxu0 %vm297_vm1, %v245_v45  ;;  %1863 = vmatmul.mubr.msk.f32.gmra.mxu1 %vm297_vm1, %v284_v46 }
  0x46   : > { %1865 = vmatprep.mubr.msk.f32.mxu1 %vm297_vm1, %v285_v47 }
  0x48   : > { %1806 = vmatmul.mubr.msk.f32.gmra.mxu0 %vm297_vm1, %v246_v48 }
  0x49   : > { %1808 = vmatprep.mubr.msk.f32.mxu0 %vm297_vm1, %v247_v49  ;;  %1866 = vmatmul.mubr.msk.f32.gmra.mxu1 %vm297_vm1, %v286_v50 }
  0x4a   : > { %1868 = vmatprep.mubr.msk.f32.mxu1 %vm297_vm1, %v287_v51 }
  0x4c   : > { %1809 = vmatmul.mubr.msk.f32.gmra.mxu0 %vm297_vm1, %v248_v52 }
  0x4d   : > { %1811 = vmatprep.mubr.msk.f32.mxu0 %vm297_vm1, %v249_v53  ;;  %1869 = vmatmul.mubr.msk.f32.gmra.mxu1 %vm297_vm1, %v288_v54 }
  0x4e   : > { %1871 = vmatprep.mubr.msk.f32.mxu1 %vm297_vm1, %v289_v55 }
  0x50   : > { %1812 = vmatmul.mubr.msk.f32.gmra.mxu0 %vm297_vm1, %v250_v56 }
  0x51   : > { %1814 = vmatprep.mubr.msk.f32.mxu0 %vm297_vm1, %v251_v57  ;;  %1872 = vmatmul.mubr.msk.f32.gmra.mxu1 %vm297_vm1, %v290_v58 }
  0x52   : > { %1874 = vmatprep.mubr.msk.f32.mxu1 %vm297_vm1, %v291_v59 }
  0x54   : > { %1815 = vmatmul.mubr.msk.f32.gmra.mxu0 %vm297_vm1, %v252_v60 }
  0x55   : > { %1817 = vmatprep.mubr.msk.f32.mxu0 %vm297_vm1, %v253_v61  ;;  %1875 = vmatmul.mubr.msk.f32.gmra.mxu1 %vm297_vm1, %v292_v62 }
  0x56   : > { %1877 = vmatprep.mubr.msk.f32.mxu1 %vm297_vm1, %v293_v11 }
  0x58   : > { %1818 = vmatmul.mubr.msk.f32.gmra.mxu0 %vm297_vm1, %v254_v63 }
  0x59   : > { %1820 = vmatprep.mubr.msk.f32.mxu0 %vm297_vm1, %v255_v0  ;;  %1878 = vmatmul.mubr.msk.f32.gmra.mxu1 %vm297_vm1, %v294_v12 }
  0x5c   : > { %1821 = vmatmul.mubr.msk.f32.gmra.mxu0 %vm297_vm1, %v256_v1 }
  0x5d   : > { %1823 = vmatprep.mubr.msk.f32.mxu0 %vm297_vm1, %v257_v2 }
  0x60   : > { %1824 = vmatmul.mubr.msk.f32.gmra.mxu0 %vm297_vm1, %v258_v3 }
  0x61   : > { %1826 = vmatprep.mubr.msk.f32.mxu0 %vm297_vm1, %v259_v4 }
  0x64   : > { %1827 = vmatmul.mubr.msk.f32.gmra.mxu0 %vm297_vm1, %v260_v5 }
  0x65   : > { %1829 = vmatprep.mubr.msk.f32.mxu0 %vm297_vm1, %v261_v6 }
  0x68   : > { %1830 = vmatmul.mubr.msk.f32.gmra.mxu0 %vm297_vm1, %v262_v7 }
  0xdc   : > { %v1774_v17 = vpop.f32.mrf.mxu0 }
  0xdd   : > { %v948_v18 = vmax.f32 %v1774_v17, %v2256_v16  ;;  %v1834_v20 = vpop.f32.mrf.mxu1 }
  0xde   : > { %v584_v19 = vpop.f32.mrf.mxu0  ;;  %v988_v22 = vmax.f32 %v1834_v20, %v2256_v16 }
  0xdf   : > { %1021 = vst.msk [vmem:[#allocation2 + $0x8] sm:$0xff] %vm1019_vm4, %v948_v18  ;;  %v947_v21 = vmax.f32 %v584_v19, %v2256_v16  ;;  %v784_v24 = vpop.f32.mrf.mxu1 }
  0xe0   : > { %v1777_v23 = vpop.f32.mrf.mxu0  ;;  %1061 = vst.msk [vmem:[#allocation2 + $0x148] sm:$0xff] %vm1019_vm4, %v988_v22  ;;  %v987_v26 = vmax.f32 %v784_v24, %v2256_v16 }
  0xe1   : > { %1020 = vst.msk [vmem:[#allocation2] sm:$0xff] %vm1019_vm4, %v947_v21  ;;  %v950_v25 = vmax.f32 %v1777_v23, %v2256_v16  ;;  %v1837_v28 = vpop.f32.mrf.mxu1 }
  0xe2   : > { %v594_v27 = vpop.f32.mrf.mxu0  ;;  %1060 = vst.msk [vmem:[#allocation2 + $0x140] sm:$0xff] %vm1019_vm4, %v987_v26  ;;  %v990_v30 = vmax.f32 %v1837_v28, %v2256_v16 }
  0xe3   : > { %1023 = vst.msk [vmem:[#allocation2 + $0x18] sm:$0xff] %vm1019_vm4, %v950_v25  ;;  %v949_v29 = vmax.f32 %v594_v27, %v2256_v16  ;;  %v794_v32 = vpop.f32.mrf.mxu1 }
  0xe4   : > { %v1780_v31 = vpop.f32.mrf.mxu0  ;;  %1063 = vst.msk [vmem:[#allocation2 + $0x158] sm:$0xff] %vm1019_vm4, %v990_v30  ;;  %v989_v34 = vmax.f32 %v794_v32, %v2256_v16 }
  0xe5   : > { %1022 = vst.msk [vmem:[#allocation2 + $0x10] sm:$0xff] %vm1019_vm4, %v949_v29  ;;  %v952_v33 = vmax.f32 %v1780_v31, %v2256_v16  ;;  %v1840_v36 = vpop.f32.mrf.mxu1 }
  0xe6   : > { %v604_v35 = vpop.f32.mrf.mxu0  ;;  %1062 = vst.msk [vmem:[#allocation2 + $0x150] sm:$0xff] %vm1019_vm4, %v989_v34  ;;  %v992_v38 = vmax.f32 %v1840_v36, %v2256_v16 }
  0xe7   : > { %1025 = vst.msk [vmem:[#allocation2 + $0x28] sm:$0xff] %vm1019_vm4, %v952_v33  ;;  %v951_v37 = vmax.f32 %v604_v35, %v2256_v16  ;;  %v804_v40 = vpop.f32.mrf.mxu1 }
  0xe8   : > { %v1783_v39 = vpop.f32.mrf.mxu0  ;;  %1065 = vst.msk [vmem:[#allocation2 + $0x168] sm:$0xff] %vm1019_vm4, %v992_v38  ;;  %v991_v42 = vmax.f32 %v804_v40, %v2256_v16 }
  0xe9   : > { %1024 = vst.msk [vmem:[#allocation2 + $0x20] sm:$0xff] %vm1019_vm4, %v951_v37  ;;  %v954_v41 = vmax.f32 %v1783_v39, %v2256_v16  ;;  %v1843_v44 = vpop.f32.mrf.mxu1 }
  0xea   : > { %v614_v43 = vpop.f32.mrf.mxu0  ;;  %1064 = vst.msk [vmem:[#allocation2 + $0x160] sm:$0xff] %vm1019_vm4, %v991_v42  ;;  %v994_v46 = vmax.f32 %v1843_v44, %v2256_v16 }
  0xeb   : > { %1027 = vst.msk [vmem:[#allocation2 + $0x38] sm:$0xff] %vm1019_vm4, %v954_v41  ;;  %v953_v45 = vmax.f32 %v614_v43, %v2256_v16  ;;  %v814_v48 = vpop.f32.mrf.mxu1 }
  0xec   : > { %v1786_v47 = vpop.f32.mrf.mxu0  ;;  %1067 = vst.msk [vmem:[#allocation2 + $0x178] sm:$0xff] %vm1019_vm4, %v994_v46  ;;  %v993_v50 = vmax.f32 %v814_v48, %v2256_v16 }
  0xed   : > { %1026 = vst.msk [vmem:[#allocation2 + $0x30] sm:$0xff] %vm1019_vm4, %v953_v45  ;;  %v956_v49 = vmax.f32 %v1786_v47, %v2256_v16  ;;  %v1846_v52 = vpop.f32.mrf.mxu1 }
  0xee   : > { %v624_v51 = vpop.f32.mrf.mxu0  ;;  %1066 = vst.msk [vmem:[#allocation2 + $0x170] sm:$0xff] %vm1019_vm4, %v993_v50  ;;  %v996_v54 = vmax.f32 %v1846_v52, %v2256_v16 }
  0xef   : > { %1029 = vst.msk [vmem:[#allocation2 + $0x48] sm:$0xff] %vm1019_vm4, %v956_v49  ;;  %v955_v53 = vmax.f32 %v624_v51, %v2256_v16  ;;  %v824_v56 = vpop.f32.mrf.mxu1 }
  0xf0   : > { %v1789_v55 = vpop.f32.mrf.mxu0  ;;  %1069 = vst.msk [vmem:[#allocation2 + $0x188] sm:$0xff] %vm1019_vm4, %v996_v54  ;;  %v995_v58 = vmax.f32 %v824_v56, %v2256_v16 }
  0xf1   : > { %1028 = vst.msk [vmem:[#allocation2 + $0x40] sm:$0xff] %vm1019_vm4, %v955_v53  ;;  %v958_v57 = vmax.f32 %v1789_v55, %v2256_v16  ;;  %v1849_v60 = vpop.f32.mrf.mxu1 }
  0xf2   : > { %v634_v59 = vpop.f32.mrf.mxu0  ;;  %1068 = vst.msk [vmem:[#allocation2 + $0x180] sm:$0xff] %vm1019_vm4, %v995_v58  ;;  %v998_v62 = vmax.f32 %v1849_v60, %v2256_v16 }
  0xf3   : > { %1031 = vst.msk [vmem:[#allocation2 + $0x58] sm:$0xff] %vm1019_vm4, %v958_v57  ;;  %v957_v61 = vmax.f32 %v634_v59, %v2256_v16  ;;  %v834_v0 = vpop.f32.mrf.mxu1  ;;  %v1103_v59 = vshrl.u32 %v943_v13, 7 }
  0xf4   : > { %v1792_v63 = vpop.f32.mrf.mxu0  ;;  %1071 = vst.msk [vmem:[#allocation2 + $0x198] sm:$0xff] %vm1019_vm4, %v998_v62  ;;  %v997_v2 = vmax.f32 %v834_v0, %v2256_v16 }
  0xf5   : > { %1030 = vst.msk [vmem:[#allocation2 + $0x50] sm:$0xff] %vm1019_vm4, %v957_v61  ;;  %v960_v1 = vmax.f32 %v1792_v63, %v2256_v16  ;;  %v1852_v4 = vpop.f32.mrf.mxu1  ;;  %v1104_v0 = vsub.s32 0, %v1103_v59  ;;  %v1190_v13 = vsub.s32 3, %v1103_v59 }
  0xf6   : > { %v644_v3 = vpop.f32.mrf.mxu0  ;;  %1070 = vst.msk [vmem:[#allocation2 + $0x190] sm:$0xff] %vm1019_vm4, %v997_v2  ;;  %v1092_v2 = vld [vmem:[%s2631_s2] sm:$0xff]  ;;  %v1247_v4 = vsub.s32 5, %v1103_v59 }
  0xf7   : > { %1033 = vst.msk [vmem:[#allocation2 + $0x68] sm:$0xff] %vm1019_vm4, %v960_v1  ;;  %v959_v5 = vmax.f32 %v644_v3, %v2256_v16  ;;  %v844_v7 = vpop.f32.mrf.mxu1  ;;  %v1133_v1 = vsub.s32 1, %v1103_v59  ;;  %v1161_v3 = vsub.s32 2, %v1103_v59 }
  0xf8   : > { %v1795_v6 = vpop.f32.mrf.mxu0 }
  0xf9   : > { %1032 = vst.msk [vmem:[#allocation2 + $0x60] sm:$0xff] %vm1019_vm4, %v959_v5  ;;  %v962_v8 = vmax.f32 %v1795_v6, %v2256_v16  ;;  %v1855_v10 = vpop.f32.mrf.mxu1  ;;  %v1276_v6 = vsub.s32 6, %v1103_v59 }
  0xfa   : > { %v654_v9 = vpop.f32.mrf.mxu0 }
  0xfb   : > { %1035 = vst.msk [vmem:[#allocation2 + $0x78] sm:$0xff] %vm1019_vm4, %v962_v8  ;;  %v961_v11 = vmax.f32 %v654_v9, %v2256_v16  ;;  %v854_v14 = vpop.f32.mrf.mxu1  ;;  %v1305_v8 = vsub.s32 7, %v1103_v59 }
  0xfc   : > { %v1798_v12 = vpop.f32.mrf.mxu0  ;;  %v1001_v17 = vmax.f32 %v854_v14, %v2256_v16  ;;  %v1219_v14 = vsub.s32 4, %v1103_v59  ;;  %v2428_v59 = vld [vmem:[#allocation2 + $0x50] sm:$0xff] }
  0xfd   : > { %1034 = vst.msk [vmem:[#allocation2 + $0x70] sm:$0xff] %vm1019_vm4, %v961_v11  ;;  %v964_v15 = vmax.f32 %v1798_v12, %v2256_v16  ;;  %v1858_v19 = vpop.f32.mrf.mxu1  ;;  %v2355_v11 = vrot.slane %v1092_v2, %v1104_v0  ;;  %v2357_v12 = vrot.slane %v1092_v2, %v1133_v1  ;;  %v1240_v0 = vld [vmem:[#allocation2 + $0x151] sm:$0xff]  ;;  %v2434_v1 = vld [vmem:[#allocation2 + $0x41] sm:$0xff] }
  0xfe   : > { %v664_v18 = vpop.f32.mrf.mxu0  ;;  %1074 = vst.msk [vmem:[#allocation2 + $0x1b0] sm:$0xff] %vm1019_vm4, %v1001_v17  ;;  %v2360_v17 = vrot.slane %v1092_v2, %v1161_v3  ;;  %v2364_v19 = vrot.slane %v1092_v2, %v1247_v4 }
  0xff   : > { %1037 = vst.msk [vmem:[#allocation2 + $0x88] sm:$0xff] %vm1019_vm4, %v964_v15  ;;  %v963_v20 = vmax.f32 %v664_v18, %v2256_v16  ;;  %v864_v22 = vpop.f32.mrf.mxu1  ;;  %v1094_v15 = vld [vmem:[#allocation2] sm:$0xff]  ;;  %v2362_v18 = vrot.slane %v1092_v2, %v1190_v13 }
 0x100   : > { %v1801_v21 = vpop.f32.mrf.mxu0  ;;  %v1003_v23 = vmax.f32 %v864_v22, %v2256_v16 }
 0x101   : > { %1036 = vst.msk [vmem:[#allocation2 + $0x80] sm:$0xff] %vm1019_vm4, %v963_v20  ;;  %v1861_v25 = vpop.f32.mrf.mxu1  ;;  %v2366_v20 = vld [vmem:[#allocation2 + $0x20] sm:$0xff] }
 0x102   : > { %v674_v24 = vpop.f32.mrf.mxu0  ;;  %1076 = vst.msk [vmem:[#allocation2 + $0x1c0] sm:$0xff] %vm1019_vm4, %v1003_v23  ;;  %v1151_v23 = vld [vmem:[#allocation2 + $0x1] sm:$0xff] }
 0x103   : > { %v965_v26 = vmax.f32 %v674_v24, %v2256_v16  ;;  %v874_v28 = vpop.f32.mrf.mxu1  ;;  %v2370_v24 = vrot.slane %v1092_v2, %v1276_v6 }
 0x104   : > { %v1804_v27 = vpop.f32.mrf.mxu0  ;;  %v1005_v29 = vmax.f32 %v874_v28, %v2256_v16 }
 0x105   : > { %1038 = vst.msk [vmem:[#allocation2 + $0x90] sm:$0xff] %vm1019_vm4, %v965_v26  ;;  %v1864_v31 = vpop.f32.mrf.mxu1  ;;  %v1182_v26 = vld [vmem:[#allocation2 + $0x140] sm:$0xff] }
 0x106   : > { %v684_v30 = vpop.f32.mrf.mxu0  ;;  %1078 = vst.msk [vmem:[#allocation2 + $0x1d0] sm:$0xff] %vm1019_vm4, %v1005_v29  ;;  %v1239_v27 = vld [vmem:[#allocation2 + $0x141] sm:$0xff]  ;;  %v1266_v29 = vld [vmem:[#allocation2 + $0x10] sm:$0xff] }
 0x107   : > { %v967_v32 = vmax.f32 %v684_v30, %v2256_v16  ;;  %v884_v34 = vpop.f32.mrf.mxu1  ;;  %v2375_v30 = vrot.slane %v1092_v2, %v1305_v8  ;;  %v2377_v31 = vld [vmem:[#allocation2 + $0x30] sm:$0xff]  ;;  %v2448_v8 = vld [vmem:[#allocation2 + $0x60] sm:$0xff] }
 0x108   : > { %v1807_v33 = vpop.f32.mrf.mxu0  ;;  %v1007_v35 = vmax.f32 %v884_v34, %v2256_v16  ;;  %v2384_v34 = vld [vmem:[%s2631_s2 + $0x8] ss:$0 sm:$0xff] }
 0x109   : > { %1040 = vst.msk [vmem:[#allocation2 + $0xa0] sm:$0xff] %vm1019_vm4, %v967_v32  ;;  %v1867_v37 = vpop.f32.mrf.mxu1 }
 0x10a   : > { %v694_v36 = vpop.f32.mrf.mxu0  ;;  %1080 = vst.msk [vmem:[#allocation2 + $0x1e0] sm:$0xff] %vm1019_vm4, %v1007_v35  ;;  %v2387_v35 = vmul.f32 %v2355_v11, %v1094_v15  ;;  %v1323_v37 = vld [vmem:[#allocation2 + $0x11] sm:$0xff] }
 0x10b   : > { %v969_v38 = vmax.f32 %v694_v36, %v2256_v16  ;;  %v894_v40 = vpop.f32.mrf.mxu1  ;;  %v2389_v36 = vrot.slane %v1092_v2, %v1219_v14 }
 0x10c   : > { %v1810_v39 = vpop.f32.mrf.mxu0  ;;  %v1009_v41 = vmax.f32 %v894_v40, %v2256_v16 }
 0x10d   : > { %1042 = vst.msk [vmem:[#allocation2 + $0xb0] sm:$0xff] %vm1019_vm4, %v969_v38  ;;  %v1870_v43 = vpop.f32.mrf.mxu1  ;;  %v1108_v38 = vmul.f32 %v2366_v20, %v2355_v11 }
 0x10e   : > { %v704_v42 = vpop.f32.mrf.mxu0  ;;  %1082 = vst.msk [vmem:[#allocation2 + $0x1f0] sm:$0xff] %vm1019_vm4, %v1009_v41  ;;  %v2398_v41 = vmul.f32 %v2360_v17, %v1151_v23  ;;  %v1194_v43 = vmul.f32 %v2362_v18, %v1182_v26  ;;  %v2450_v23 = vld [vmem:[#allocation2 + $0x51] sm:$0xff] }
 0x10f   : > { %v971_v44 = vmax.f32 %v704_v42, %v2256_v16  ;;  %v904_v46 = vpop.f32.mrf.mxu1  ;;  %v2400_v42 = vld [vmem:[#allocation2 + $0x21] sm:$0xff]  ;;  %2640 = vst [vmem:[#allocation6_spill] sm:$0xff] %v2450_v23 }
 0x110   : > { %v1813_v45 = vpop.f32.mrf.mxu0  ;;  %v1011_v47 = vmax.f32 %v904_v46, %v2256_v16 }
 0x111   : > { %1044 = vst.msk [vmem:[#allocation2 + $0xc0] sm:$0xff] %vm1019_vm4, %v971_v44  ;;  %v1873_v49 = vpop.f32.mrf.mxu1  ;;  %v2404_v44 = vmul.f32 %v2364_v19, %v1239_v27  ;;  %v2406_v45 = vld [vmem:[#allocation2 + $0x40] sm:$0xff] }
 0x112   : > { %v714_v48 = vpop.f32.mrf.mxu0  ;;  %1084 = vst.msk [vmem:[#allocation2 + $0x200] sm:$0xff] %vm1019_vm4, %v1011_v47  ;;  %v2411_v49 = vmul.f32 %v2370_v24, %v1266_v29  ;;  %v1110_v2 = vmul.f32 %v2406_v45, %v2355_v11 }
 0x113   : > { %v973_v50 = vmax.f32 %v714_v48, %v2256_v16  ;;  %v914_v52 = vpop.f32.mrf.mxu1  ;;  %v1123_v48 = vld [vmem:[#allocation2 + $0x90] sm:$0xff] }
 0x114   : > { %v1816_v51 = vpop.f32.mrf.mxu0  ;;  %v1013_v53 = vmax.f32 %v914_v52, %v2256_v16  ;;  %v2353_v9 = vld [vmem:[#allocation2 + $0xb0] sm:$0xff]  ;;  %v1109_v52 = vmul.f32 %v2377_v31, %v2355_v11  ;;  %v1135_v4 = vmul.f32 %v2357_v12, %v1123_v48 }
 0x115   : > { %1046 = vst.msk [vmem:[#allocation2 + $0xd0] sm:$0xff] %vm1019_vm4, %v973_v50  ;;  %v1876_v55 = vpop.f32.mrf.mxu1  ;;  %v1137_v25 = vmul.f32 %v2353_v9, %v2357_v12  ;;  %v2413_v51 = vld [vmem:[#allocation2 + $0x31] sm:$0xff] }
 0x116   : > { %v724_v54 = vpop.f32.mrf.mxu0  ;;  %1086 = vst.msk [vmem:[#allocation2 + $0x210] sm:$0xff] %vm1019_vm4, %v1013_v53  ;;  %v1183_v53 = vld [vmem:[#allocation2 + $0x150] sm:$0xff]  ;;  %v1166_v6 = vmul.f32 %v2413_v51, %v2360_v17 }
 0x117   : > { %v975_v56 = vmax.f32 %v724_v54, %v2256_v16  ;;  %v924_v58 = vpop.f32.mrf.mxu1  ;;  %v1145_v50 = vadd.f32 %v1137_v25, %v1108_v38  ;;  %v1111_v25 = vmul.f32 %v2428_v59, %v2355_v11  ;;  %v1167_v38 = vmul.f32 %v2434_v1, %v2360_v17 }
 0x118   : > { %v1819_v57 = vpop.f32.mrf.mxu0  ;;  %v1015_v60 = vmax.f32 %v924_v58, %v2256_v16  ;;  %v2368_v21 = vld [vmem:[#allocation2 + $0xc0] sm:$0xff]  ;;  %v2426_v58 = vmul.f32 %v1323_v37, %v2360_v17 }
 0x119   : > { %1048 = vst.msk [vmem:[#allocation2 + $0xe0] sm:$0xff] %vm1019_vm4, %v975_v56  ;;  %v1138_v39 = vmul.f32 %v2368_v21, %v2357_v12  ;;  %v2422_v56 = vmul.f32 %v2384_v34, %v1323_v37  ;;  %v1107_v57 = vmul.f32 %v1266_v29, %v2355_v11  ;;  %v2462_v29 = vmul.f32 %v2370_v24, %v2366_v20  ;;  %v2475_v20 = vld [vmem:[#allocation2 + $0x70] sm:$0xff] }
 0x11a   : > { %v734_v61 = vpop.f32.mrf.mxu0  ;;  %1088 = vst.msk [vmem:[#allocation2 + $0x220] sm:$0xff] %vm1019_vm4, %v1015_v60  ;;  %v2465_v37 = vmul.f32 %v2364_v19, %v1240_v0 }
 0x11b   : > { %v977_v62 = vmax.f32 %v734_v61, %v2256_v16 }
 0x11c   : > { %v1822_v63 = vpop.f32.mrf.mxu0  ;;  %v2379_v32 = vld [vmem:[#allocation2 + $0xd0] sm:$0xff] }
 0x11d   : > { %1050 = vst.msk [vmem:[#allocation2 + $0xf0] sm:$0xff] %vm1019_vm4, %v977_v62  ;;  %v1139_v54 = vmul.f32 %v2379_v32, %v2357_v12  ;;  %v1165_v62 = vmul.f32 %v2400_v42, %v2360_v17  ;;  %v1146_v63 = vadd.f32 %v1138_v39, %v1109_v52  ;;  %v1143_v52 = vadd.f32 %v1135_v4, %v2387_v35 }
 0x11e   : > { %v744_v5 = vpop.f32.mrf.mxu0 }
 0x11f   : > { %v979_v7 = vmax.f32 %v744_v5, %v2256_v16  ;;  %v2443_v5 = vld [vmem:[#allocation2 + $0xa0] sm:$0xff]  ;;  %v1173_v14 = vadd.f32 %v1165_v62, %v1145_v50  ;;  %v1147_v15 = vadd.f32 %v1139_v54, %v1110_v2  ;;  %v1185_v2 = vld [vmem:[#allocation2 + $0x170] sm:$0xff] }
 0x120   : > { %v1825_v10 = vpop.f32.mrf.mxu0  ;;  %v2408_v46 = vld [vmem:[#allocation2 + $0xe0] sm:$0xff]  ;;  %v1136_v39 = vmul.f32 %v2443_v5, %v2357_v12 }
 0x121   : > { %1052 = vst.msk [vmem:[#allocation2 + $0x100] sm:$0xff] %vm1019_vm4, %v979_v7  ;;  %v1140_v3 = vmul.f32 %v2408_v46, %v2357_v12  ;;  %v1195_v7 = vmul.f32 %v2362_v18, %v1183_v53  ;;  %v2471_v50 = vld [vmem:[#allocation2 + $0x61] sm:$0xff]  ;;  %v1202_v62 = vadd.f32 %v1194_v43, %v1173_v14  ;;  %v1175_v0 = vadd.f32 %v1167_v38, %v1147_v15  ;;  %v1209_v43 = vld [vmem:[#allocation2 + $0x1b0] sm:$0xff] }
 0x122   : > { %v754_v22 = vpop.f32.mrf.mxu0  ;;  %2642 = vst [vmem:[#allocation8_spill] sm:$0xff] %v2471_v50  ;;  %v1212_v53 = vld [vmem:[#allocation2 + $0x1e0] sm:$0xff]  ;;  %v1169_v4 = vmul.f32 %v2471_v50, %v2360_v17  ;;  %v1144_v14 = vadd.f32 %v1136_v39, %v1107_v57  ;;  %v1197_v38 = vmul.f32 %v2362_v18, %v1185_v2  ;;  %v1221_v39 = vmul.f32 %v2389_v36, %v1209_v43 }
 0x123   : > { %v981_v28 = vmax.f32 %v754_v22, %v2256_v16  ;;  %v1184_v22 = vld [vmem:[#allocation2 + $0x160] sm:$0xff]  ;;  %v1148_v48 = vadd.f32 %v1140_v3, %v1111_v25  ;;  %v1224_v15 = vmul.f32 %v2389_v36, %v1212_v53 }
 0x124   : > { %v1828_v33 = vpop.f32.mrf.mxu0  ;;  %v2430_v60 = vld [vmem:[#allocation2 + $0xf0] sm:$0xff]  ;;  %v1196_v54 = vmul.f32 %v2362_v18, %v1184_v22  ;;  %v1113_v22 = vmul.f32 %v2475_v20, %v2355_v11 }
 0x125   : > { %1054 = vst.msk [vmem:[#allocation2 + $0x110] sm:$0xff] %vm1019_vm4, %v981_v28  ;;  %v984_v40 = vmax.f32 %v1828_v33, %v2256_v16  ;;  %v1141_v26 = vmul.f32 %v2430_v60, %v2357_v12  ;;  %v1211_v33 = vld [vmem:[#allocation2 + $0x1d0] sm:$0xff] }
 0x126   : > { %v764_v47 = vpop.f32.mrf.mxu0 }
 0x127   : > { %1057 = vst.msk [vmem:[#allocation2 + $0x128] sm:$0xff] %vm1019_vm4, %v984_v40  ;;  %v983_v55 = vmax.f32 %v764_v47, %v2256_v16  ;;  %v1174_v40 = vadd.f32 %v1166_v6, %v1146_v63  ;;  %v1241_v47 = vld [vmem:[#allocation2 + $0x161] sm:$0xff]  ;;  %v1223_v63 = vmul.f32 %v2389_v36, %v1211_v33  ;;  %v1213_v6 = vld [vmem:[#allocation2 + $0x1f0] sm:$0xff] }
 0x128   : > { %v1831_v61 = vpop.f32.mrf.mxu0  ;;  %v2456_v27 = vld [vmem:[#allocation2 + $0x100] sm:$0xff]  ;;  %v1253_v35 = vmul.f32 %v2364_v19, %v1241_v47 }
 0x129   : > { %1056 = vst.msk [vmem:[#allocation2 + $0x120] sm:$0xff] %vm1019_vm4, %v983_v55  ;;  %v986_v13 = vmax.f32 %v1831_v61, %v2256_v16  ;;  %2641 = vst [vmem:[#allocation7_spill] sm:$0xff] %v2456_v27  ;;  %v1168_v55 = vmul.f32 %v2450_v23, %v2360_v17  ;;  %v1142_v61 = vmul.f32 %v2456_v27, %v2357_v12  ;;  %v1214_v47 = vld [vmem:[#allocation2 + $0x200] sm:$0xff] }
 0x12a   : > { %v774_v10 = vpop.f32.mrf.mxu0  ;;  %v1203_v25 = vadd.f32 %v1195_v7, %v1174_v40  ;;  %v1231_v27 = vadd.f32 %v1223_v63, %v1202_v62  ;;  %v1225_v23 = vmul.f32 %v2389_v36, %v1213_v6  ;;  %v1187_v62 = vld [vmem:[#allocation2 + $0x190] sm:$0xff] }
 0x12b   : > { %1059 = vst.msk [vmem:[#allocation2 + $0x138] sm:$0xff] %vm1019_vm4, %v986_v13  ;;  %v985_v28 = vmax.f32 %v774_v10, %v2256_v16  ;;  %v1112_v16 = vmul.f32 %v2448_v8, %v2355_v11  ;;  %v1280_v13 = vmul.f32 %v2370_v24, %v2377_v31  ;;  %v1186_v10 = vld [vmem:[#allocation2 + $0x180] sm:$0xff]  ;;  %v1171_v31 = vadd.f32 %v2398_v41, %v1143_v52 }
 0x12c   : > { %v1204_v11 = vadd.f32 %v1196_v54, %v1175_v0  ;;  %v1198_v40 = vmul.f32 %v2362_v18, %v1186_v10  ;;  %v1172_v52 = vadd.f32 %v2426_v58, %v1144_v14  ;;  %v1226_v54 = vmul.f32 %v2389_v36, %v1214_v47 }
 0x12d   : > { %1058 = vst.msk [vmem:[#allocation2 + $0x130] sm:$0xff] %vm1019_vm4, %v985_v28  ;;  %v1149_v3 = vadd.f32 %v1141_v26, %v1112_v16  ;;  %v1176_v26 = vadd.f32 %v1168_v55, %v1148_v48  ;;  %v2493_v28 = vld [vmem:[#allocation2 + $0x71] sm:$0xff]  ;;  %v1150_v16 = vadd.f32 %v1142_v61, %v1113_v22  ;;  %v1210_v55 = vld [vmem:[#allocation2 + $0x1c0] sm:$0xff]  ;;  %v1232_v61 = vadd.f32 %v1224_v15, %v1203_v25 }
 0x12e   : > { %v1215_v48 = vld [vmem:[#allocation2 + $0x210] sm:$0xff]  ;;  %v1170_v41 = vmul.f32 %v2493_v28, %v2360_v17  ;;  %v1259_v22 = vadd.f32 %v2404_v44, %v1231_v27  ;;  %v1233_v17 = vadd.f32 %v1225_v23, %v1204_v11  ;;  %v1222_v25 = vmul.f32 %v2389_v36, %v1210_v55 }
 0x12f   : > { %v1177_v57 = vadd.f32 %v1169_v4, %v1149_v3  ;;  %v1205_v2 = vadd.f32 %v1197_v38, %v1176_v26  ;;  %v1216_v4 = vld [vmem:[#allocation2 + $0x220] sm:$0xff]  ;;  %v1227_v58 = vmul.f32 %v2389_v36, %v1215_v48  ;;  %v1199_v15 = vmul.f32 %v2362_v18, %v1187_v62 }
 0x130   : > { %v1180_v12 = vld [vmem:[#allocation2 + $0x120] sm:$0xff]  ;;  %v1178_v6 = vadd.f32 %v1170_v41, %v1150_v16  ;;  %v1260_v26 = vadd.f32 %v2465_v37, %v1232_v61  ;;  %v1228_v44 = vmul.f32 %v2389_v36, %v1216_v4  ;;  %v1288_v11 = vadd.f32 %v1280_v13, %v1259_v22  ;;  %v1244_v41 = vld [vmem:[#allocation2 + $0x191] sm:$0xff] }
 0x131   : > { %v1192_v33 = vmul.f32 %v2362_v18, %v1180_v12  ;;  %v1237_v50 = vld [vmem:[#allocation2 + $0x121] sm:$0xff]  ;;  %v1206_v12 = vadd.f32 %v1198_v40, %v1177_v57  ;;  %v1261_v57 = vadd.f32 %v1253_v35, %v1233_v17  ;;  %v1308_v36 = vmul.f32 %v2375_v30, %v2353_v9 }
 0x132   : > { %v1249_v0 = vmul.f32 %v2364_v19, %v1237_v50  ;;  %v1307_v50 = vmul.f32 %v2375_v30, %v2443_v5  ;;  %v1243_v38 = vld [vmem:[#allocation2 + $0x181] sm:$0xff]  ;;  %v1207_v16 = vadd.f32 %v1199_v15, %v1178_v6  ;;  %v1282_v13 = vmul.f32 %v2370_v24, %v2428_v59 }
 0x133   : > { %v1200_v7 = vadd.f32 %v1192_v33, %v1171_v31  ;;  %v1234_v31 = vadd.f32 %v1226_v54, %v1205_v2  ;;  %v1242_v33 = vld [vmem:[#allocation2 + $0x171] sm:$0xff]  ;;  %v1255_v40 = vmul.f32 %v2364_v19, %v1243_v38  ;;  %v1336_v55 = vmul.f32 %v2384_v34, %v2400_v42  ;;  %v2644_v17 = vld [vmem:[#allocation7_spill] sm:$0xff] }
 0x134   : > { %v1181_v53 = vld [vmem:[#allocation2 + $0x130] sm:$0xff]  ;;  %v1254_v37 = vmul.f32 %v2364_v19, %v1242_v33  ;;  %v1290_v2 = vadd.f32 %v1282_v13, %v1261_v57  ;;  %v1310_v54 = vmul.f32 %v2375_v30, %v2379_v32  ;;  %v1283_v59 = vmul.f32 %v2370_v24, %v2448_v8  ;;  %v2643_v8 = vld [vmem:[#allocation6_spill] sm:$0xff] }
 0x135   : > { %v1229_v63 = vadd.f32 %v1221_v39, %v1200_v7  ;;  %v1193_v3 = vmul.f32 %v2362_v18, %v1181_v53  ;;  %v1238_v10 = vld [vmem:[#allocation2 + $0x131] sm:$0xff]  ;;  %v1281_v18 = vmul.f32 %v2370_v24, %v2406_v45  ;;  %v1235_v7 = vadd.f32 %v1227_v58, %v1206_v12 }
 0x136   : > { %v1250_v47 = vmul.f32 %v2364_v19, %v1238_v10  ;;  %v1236_v53 = vadd.f32 %v1228_v44, %v1207_v16  ;;  %v1311_v42 = vmul.f32 %v2375_v30, %v2408_v46  ;;  %v1284_v62 = vmul.f32 %v2370_v24, %v2475_v20  ;;  %v1302_v58 = vld [vmem:[#allocation2 + $0x110] sm:$0xff] }
 0x137   : > { %v1257_v43 = vadd.f32 %v1249_v0, %v1229_v63  ;;  %v1201_v14 = vadd.f32 %v1193_v3, %v1172_v52  ;;  %v1289_v48 = vadd.f32 %v1281_v18, %v1260_v26  ;;  %v1262_v52 = vadd.f32 %v1254_v37, %v1234_v31  ;;  %v1273_v63 = vld [vmem:[#allocation2 + $0x80] sm:$0xff] }
 0x138   : > { %v1263_v9 = vadd.f32 %v1255_v40, %v1235_v7  ;;  %v1319_v10 = vadd.f32 %v1311_v42, %v1290_v2  ;;  %v1285_v46 = vmul.f32 %v2370_v24, %v1273_v63  ;;  %v1339_v20 = vmul.f32 %v2384_v34, %v2643_v8  ;;  %v1330_v31 = vld [vmem:[#allocation2 + $0x81] sm:$0xff] }
 0x139   : > { %v1286_v23 = vadd.f32 %v2411_v49, %v1257_v43  ;;  %v1230_v27 = vadd.f32 %v1222_v25, %v1201_v14  ;;  %v1309_v49 = vmul.f32 %v2375_v30, %v2368_v21  ;;  %v1318_v3 = vadd.f32 %v1310_v54, %v1289_v48 }
 0x13a   : > { %v1291_v6 = vadd.f32 %v1283_v59, %v1262_v52  ;;  %v1292_v22 = vadd.f32 %v1284_v62, %v1263_v9  ;;  %v1313_v12 = vmul.f32 %v2375_v30, %v2644_v17  ;;  %v1347_v15 = vadd.f32 %v1339_v20, %v1319_v10 }
 0x13b   : > { %v1315_v5 = vadd.f32 %v1307_v50, %v1286_v23  ;;  %v1258_v39 = vadd.f32 %v1250_v47, %v1230_v27  ;;  %v1317_v61 = vadd.f32 %v1309_v49, %v1288_v11  ;;  %v1341_v26 = vmul.f32 %v2384_v34, %v2493_v28  ;;  %v1667_v28 = vld [vmem:[%s2633_s4] ss:$0 sm:$0xff] }
 0x13c   : > { %v1321_v50 = vadd.f32 %v1313_v12, %v1292_v22  ;;  %v1342_v23 = vmul.f32 %v2384_v34, %v1330_v31 }
 0x13d   : > { %v1343_v45 = vadd.f32 %v2422_v56, %v1315_v5  ;;  %v1287_v35 = vadd.f32 %v2462_v29, %v1258_v39  ;;  %v1256_v56 = vmul.f32 %v2364_v19, %v1244_v41  ;;  %v1337_v29 = vmul.f32 %v2384_v34, %v2413_v51 }
 0x13e   : > { %v1338_v19 = vmul.f32 %v2384_v34, %v2434_v1  ;;  %v1312_v51 = vmul.f32 %v2375_v30, %v2430_v60  ;;  %v2645_v1 = vld [vmem:[#allocation8_spill] sm:$0xff]  ;;  %v1314_v60 = vmul.f32 %v2375_v30, %v1302_v58  ;;  %v1349_v44 = vadd.f32 %v1341_v26, %v1321_v50  ;;  %v1879_v30 = vpop.f32.mrf.mxu1 }
 0x13f   : > { %1886 = vmatprep.mubr.msk.f32.mxu1 %vm1019_vm4, %v1343_v45  ;;  %v1316_v21 = vadd.f32 %v1308_v36, %v1287_v35  ;;  %v1264_v4 = vadd.f32 %v1256_v56, %v1236_v53  ;;  %v1345_v32 = vadd.f32 %v1337_v29, %v1317_v61  ;;  %v1340_v24 = vmul.f32 %v2384_v34, %v2645_v1 }
 0x140   : > { %v1346_v43 = vadd.f32 %v1338_v19, %v1318_v3  ;;  %v1320_v14 = vadd.f32 %v1312_v51, %v1291_v6  ;;  %v934_v47 = vpop.f32.mrf.mxu1 }
 0x141   : > { %v1344_v0 = vadd.f32 %v1336_v55, %v1316_v21  ;;  %v1293_v25 = vadd.f32 %v1285_v46, %v1264_v4 }
 0x142   : > { %v1348_v33 = vadd.f32 %v1340_v24, %v1320_v14 }
 0x143   : > { %1887 = vmatmul.mubr.msk.f32.vlgmr.msra.gmra.mxu1 %vm1019_vm4, %v1344_v0  ;;  %v1322_v38 = vadd.f32 %v1314_v60, %v1293_v25 }
 0x144   : > { %1889 = vmatprep.mubr.msk.f32.mxu1 %vm1019_vm4, %v1345_v32 }
 0x145   : > { %v1350_v27 = vadd.f32 %v1342_v23, %v1322_v38 }
 0x147   : > { %1890 = vmatmul.mubr.msk.f32.gmra.mxu1 %vm1019_vm4, %v1346_v43 }
 0x148   : > { %1892 = vmatprep.mubr.msk.f32.mxu1 %vm1019_vm4, %v1347_v15 }
 0x14b   : > { %1893 = vmatmul.mubr.msk.f32.gmra.mxu1 %vm1019_vm4, %v1348_v33 }
 0x14c   : > { %1895 = vmatprep.mubr.msk.f32.mxu1 %vm1019_vm4, %v1349_v44 }
 0x14f   : > { %1896 = vmatmul.mubr.msk.f32.gmra.mxu1 %vm1019_vm4, %v1350_v27 }
 0x203   : > { %v1888_v16 = vpop.f32.mrf.mxu1 }
 0x204   : > { %v1461_v11 = vadd.f32 %v1888_v16, %v1667_v28 }
 0x205   : > { %v1455_v18 = vpop.f32.mrf.mxu1 }
 0x206   : > { %v1495_v57 = vmax.f32 %v1461_v11, 0.0  ;;  %v1456_v34 = vadd.f32 %v1667_v28, %v1455_v18 }
 0x207   : > { %v1891_v7 = vpop.f32.mrf.mxu1 }
 0x208   : > { %1504 = vst.msk [vmem:[%s217_s12 + $0x8] sm:$0xff] %vm1502_vm5, %v1495_v57  ;;  %v1494_v5 = vmax.f32 %v1456_v34, 0.0  ;;  %v1471_v39 = vadd.f32 %v1891_v7, %v1667_v28 }
 0x209   : > { %v1465_v37 = vpop.f32.mrf.mxu1 }
 0x20a   : > { %1503 = vst.msk [vmem:[%s217_s12] sm:$0xff] %vm1502_vm5, %v1494_v5  ;;  %v1497_v40 = vmax.f32 %v1471_v39, 0.0  ;;  %v1466_v36 = vadd.f32 %v1667_v28, %v1465_v37 }
 0x20b   : > { %v1894_v49 = vpop.f32.mrf.mxu1 }
 0x20c   : > { %1506 = vst.msk [vmem:[%s217_s12 + $0x18] sm:$0xff] %vm1502_vm5, %v1497_v40  ;;  %v1496_v48 = vmax.f32 %v1466_v36, 0.0  ;;  %v1481_v13 = vadd.f32 %v1894_v49, %v1667_v28 }
 0x20d   : > { %v1475_v41 = vpop.f32.mrf.mxu1 }
 0x20e   : > { %1505 = vst.msk [vmem:[%s217_s12 + $0x10] sm:$0xff] %vm1502_vm5, %v1496_v48  ;;  %v1499_v45 = vmax.f32 %v1481_v13, 0.0  ;;  %v1476_v35 = vadd.f32 %v1667_v28, %v1475_v41 }
 0x20f   : > { %v1897_v52 = vpop.f32.mrf.mxu1 }
 0x210   : > { %1508 = vst.msk [vmem:[%s217_s12 + $0x28] sm:$0xff] %vm1502_vm5, %v1499_v45  ;;  %v1498_v53 = vmax.f32 %v1476_v35, 0.0  ;;  %v1491_v55 = vadd.f32 %v1897_v52, %v1667_v28 }
 0x211   : > { %v1485_v61 = vpop.f32.mrf.mxu1 }
 0x212   : > { %1507 = vst.msk [vmem:[%s217_s12 + $0x20] sm:$0xff] %vm1502_vm5, %v1498_v53  ;;  %v1501_v2 = vmax.f32 %v1491_v55, 0.0  ;;  %v1486_v9 = vadd.f32 %v1667_v28, %v1485_v61 }
 0x214   : > { %1510 = vst.msk [vmem:[%s217_s12 + $0x38] sm:$0xff] %vm1502_vm5, %v1501_v2  ;;  %v1500_v21 = vmax.f32 %v1486_v9, 0.0 }
 0x216   : > { %1509 = vst.msk [vmem:[%s217_s12 + $0x30] sm:$0xff] %vm1502_vm5, %v1500_v21 }
 0x217   : > { %1958 = shalt.err (!%p1955_p3)
}
 0x218   : > { %s1959_s6 = scalar_lea.hbm %s2581_s17, 1024  ;;  %s1963_s9 = scalar_lea.hbm %s2634_s5, 2048 }
 0x219   : > { %p1960_p4 = scmp.ne.s32.totalorder %s2581_s17, %s1959_s6  ;;  %p1964_p9 = scmp.lt.s32.totalorder %s2581_s17, %s2634_s5 }
 0x21a   : > { %p1965_p10 = scmp.lt.s32.totalorder %s1963_s9, %s1959_s6 }
 0x21b   : > { %p1961_p7 = pnand %p1960_p4, %p2079_p5 }
 0x21c   : > { %p1966_p11 = por %p1965_p10, %p1964_p9 }
 0x21d   : > { %p1962_p8 = pneg %p1961_p7 }
 0x21f   : > { %p1967_p12 = pnand %p1966_p11, %p1962_p8 }
 0x221   : > { %1970 = shalt.err (!%p1967_p12)
}
 0x222   : > { %s2009_s12 = smov 128   ;;  %s2010_s13 = smov 8  }
 0x223   : > { %1903 = dma.vmem_to_hbm [thread:$0]  (%p2079_p5), %s2583_s14, 1024, %s2581_s17, %s2589_s22, %s2009_s12, %s2009_s12, %s2010_s13  }
 0x224 PF: > { %p1909_p13 = scmp.ge.s32.totalorder %s2005_s21, 2  ;;  %s1540_s15 = sand.u32 1, %s1993_s18  }
 0x225   : > { %s1541_s16 = scalar_lea.sflag [#allocation4], %s1540_s15 }
 0x226   : > { %p1906_p0 = pnand %p1909_p13, %p2083_p6 }
 0x228   : > { %p1907_p1 = pneg %p1906_p0 }
 0x22a   : > { %1988 = dma.done.wait (%p1907_p1), %s1541_s16, 1024  }
 0x22b   : > { %1990 = vsyncadd (%p1907_p1), %s1541_s16, 4294966272  ;;  %p15_p2 = scmp.ge.s32.totalorder %s2066_s24, 4   ;;  %s2646_s18 = smov %s1997_s19 }
 0x22c   : > { %s2647_s19 = smov %s2001_s20  ;;  %s2648_s20 = smov %s2077_s27 }
 0x22d   : > { %s2649_s21 = smov %s2066_s24  ;;  %17 = sbr.rel (!%p15_p2) target bundleno = 3 (0x3), region = 80 }
 0x232   :  { %1546 = vsyncpa [#allocation4], 1 }
 0x233   :  { %1548 = vsyncpa [#allocation4 + $0x1], 1 }

</bundles_post_ra>
